<compile_context>
chip_gen: v5e
topology: v5e:2x2
jax: 0.10.0
libtpu: 0.0.40
codegen_flags: <defaults>
</compile_context>

<pallas_src>
import numpy as np
import jax
import jax.numpy as jnp
from jax.experimental import pallas as pl
from jax.experimental.pallas import tpu as pltpu


def _h2n_kernel(h_ref, halo_ref, int_ref, out_ref):
    # h_ref   : (Bc, Th, W)     unpadded height rows of this tile
    # halo_ref: (Bc, 1, 2, W)   replicate-clamped rows directly above/below the tile
    # int_ref : (1, 1) SMEM     intensity scalar
    # out_ref : (Bc, 3, Th, W)  normal map
    f32 = jnp.float32
    h = h_ref[...].astype(f32)                      # (Bc, Th, W)
    halo = halo_ref[...][:, 0].astype(f32)          # (Bc, 2, W)
    h_up = halo[:, 0:1, :]                          # (Bc, 1, W) row above tile
    h_dn = halo[:, 1:2, :]                          # (Bc, 1, W) row below tile
    intensity = int_ref[0, 0]
    bc, th, w = h.shape

    # Boundary masks hoisted once per tile (reused by every shift below).
    lane = jax.lax.broadcasted_iota(jnp.int32, (1, 1, w), 2)
    first_col = lane == 0
    last_col = lane == w - 1
    row = jax.lax.broadcasted_iota(jnp.int32, (1, th, 1), 1)
    first_row = row == 0
    last_row = row == th - 1

    def horiz(a):
        # Replicate-clamped left/right neighbours along lanes via XLU rolls.
        # pltpu.roll needs non-negative shift: roll by (w-1) == rotate by -1.
        left = jnp.where(first_col, a, pltpu.roll(a, 1, a.ndim - 1))
        right = jnp.where(last_col, a, pltpu.roll(a, w - 1, a.ndim - 1))
        return right - left, left + 2.0 * a + right        # [-1,0,1], [1,2,1]

    d_h, s_h = horiz(h)                 # per-row horizontal diff / smooth
    d_up, s_up = horiz(h_up)            # same for the halo rows
    d_dn, s_dn = horiz(h_dn)

    def above(a, halo_row):             # a[i-1]; first tile row comes from halo
        return jnp.where(first_row, halo_row, pltpu.roll(a, 1, 1))

    def below(a, halo_row):             # a[i+1]; last tile row comes from halo
        return jnp.where(last_row, halo_row, pltpu.roll(a, th - 1, 1))

    # Separable Sobel cross-correlation (kornia convention):
    #   dx = [1,2,1]^T (x) [-1,0,1],   dy = [-1,0,1]^T (x) [1,2,1]
    dx = above(d_h, d_up) + 2.0 * d_h + below(d_h, d_dn)
    dy = below(s_h, s_dn) - above(s_h, s_up)

    # normal = normalize([-I*dx, I*dy, 1]); intensity folded once, rsqrt on EUP.
    sdx = intensity * dx
    sdy = intensity * dy
    inv = jax.lax.rsqrt(sdx * sdx + sdy * sdy + 1.0)
    # Per-channel stores: no jnp.stack, no extra (Bc,3,Th,W) f32 temporary.
    out_ref[:, 0] = (-sdx * inv).astype(out_ref.dtype)
    out_ref[:, 1] = (sdy * inv).astype(out_ref.dtype)
    out_ref[:, 2] = inv.astype(out_ref.dtype)


def _vmem_budget_and_limit():
    """Generation-aware (budget, vmem_limit_bytes)."""
    cap = None
    try:
        cap = int(pltpu.get_tpu_info().vmem_capacity_bytes)
    except Exception:
        cap = None
    if cap is not None and cap >= 96 * 1024 * 1024:
        # v5e / v6e: 128 MiB VMEM -> big tiles, fewer grid steps.
        return 32 * 1024 * 1024, 96 * 1024 * 1024
    # v7x (64 MiB per TensorCore) or unknown backend: stay conservative.
    return 20 * 1024 * 1024, 56 * 1024 * 1024


def _pick_row_tile(H, W, itemsize, budget):
    # Bytes per image row: double-buffered input (1 plane) + output (3 planes)
    # tiles plus ~8 float32 temporaries for the stencil.
    per_row = W * (2 * (1 + 3) * itemsize + 8 * 4)
    target = max(8, budget // max(per_row, 1))
    if H <= target:
        return H                              # whole image fits -> no row tiling
    # TODO(synk): ragged (cdiv) last tile for H with no multiple-of-8 divisor; for
    # now fall back to Th=H which may exceed the budget for awkward large H.
    best = H
    th = 8
    while th <= target:
        if H % th == 0:
            best = th
        th += 8
    return best


def _pick_batch_chunk(B, Th, W, itemsize, n_row_tiles, budget):
    per_img = Th * W * (2 * (1 + 3) * itemsize + 8 * 4)
    bc = int(max(1, min(B, budget // max(per_img, 1))))
    while B % bc:
        bc -= 1

    def steps(c):
        return (B // c) * n_row_tiles

    # Prefer an even parallel-step count (>= 4 when possible) so both v7x
    # TensorCores stay busy; harmless extra steps elsewhere (~0.35 us each).
    while bc > 1 and (steps(bc) < 4 or steps(bc) % 2):
        bc -= 1
        while B % bc:
            bc -= 1
    return bc


def height2normal(height, intensity, *, row_tile=None):
    """Pallas equivalent of Height2Normal.forward.  height: [B, 1, H, W]."""
    assert height.ndim == 4 and height.shape[1] == 1
    B, _, H, W = height.shape
    h = height[:, 0]                                   # (B, H, W); padding is fused

    budget, vmem_limit = _vmem_budget_and_limit()
    itemsize = jnp.dtype(height.dtype).itemsize
    Th = _pick_row_tile(H, W, itemsize, budget) if row_tile is None else int(row_tile)
    assert H % Th == 0 and (Th == H or Th % 8 == 0)
    T = H // Th
    Bc = _pick_batch_chunk(B, Th, W, itemsize, T, budget)

    # One pre-clamped (replicate) halo row above + below every row tile, packed
    # into a single (B, T, 2, W) array -> one small DMA per grid step.
    rows = np.arange(T)
    up_idx = np.maximum(rows * Th - 1, 0)
    dn_idx = np.minimum((rows + 1) * Th, H - 1)
    halo = jnp.stack([h[:, up_idx, :], h[:, dn_idx, :]], axis=2)   # (B, T, 2, W)

    intensity_arr = jnp.full((1, 1), intensity, dtype=jnp.float32)

    # TODO(synk): for W not a multiple of 128, fold W into the lane dim on the host
    # (with lane-roll boundary masking) so output stores are lane-dense vst instead
    # of vst.msk; pure layout plumbing, skipped here.
    # TODO(synk): on v5e, sweep pipeline_mode=pl.Buffered(3) on the height input.
    return pl.pallas_call(
        _h2n_kernel,
        out_shape=jax.ShapeDtypeStruct((B, 3, H, W), height.dtype),
        grid_spec=pltpu.PrefetchScalarGridSpec(
            num_scalar_prefetch=0,
            grid=(B // Bc, T),
            in_specs=[
                pl.BlockSpec((Bc, Th, W), lambda b, t: (b, t, 0)),
                pl.BlockSpec((Bc, 1, 2, W), lambda b, t: (b, t, 0, 0)),
                pl.BlockSpec(memory_space=pltpu.MemorySpace.SMEM),
            ],
            out_specs=pl.BlockSpec((Bc, 3, Th, W), lambda b, t: (b, 0, t, 0)),
        ),
        compiler_params=pltpu.CompilerParams(
            dimension_semantics=("parallel", "parallel"),
            vmem_limit_bytes=vmem_limit,
        ),
    )(h, halo, intensity_arr)


def _reference(height, intensity):
    """Pure-JAX reference (mirrors kornia sobel + Height2Normal)."""
    B, _, H, W = height.shape
    hp = jnp.pad(height[:, 0], ((0, 0), (1, 1), (1, 1)), mode="edge")

    def win(di, dj):
        return hp[:, di:di + H, dj:dj + W]

    dx = (-win(0, 0) + win(0, 2) - 2.0 * win(1, 0) + 2.0 * win(1, 2)
          - win(2, 0) + win(2, 2))
    dy = (-win(0, 0) - 2.0 * win(0, 1) - win(0, 2)
          + win(2, 0) + 2.0 * win(2, 1) + win(2, 2))
    x = -dx * intensity
    y = dy * intensity
    z = jnp.ones_like(dx)
    n = jnp.stack([x, y, z], axis=1)
    return n / jnp.sqrt(jnp.sum(n ** 2, axis=1, keepdims=True))


if __name__ == "__main__":
    # Deterministic "parameter" of the module (__init__ takes only intensity).
    intensity = 2.0

    key = jax.random.PRNGKey(0)
    height = jax.random.normal(key, (2, 1, 16, 16), dtype=jnp.float32)

    ref = _reference(height, intensity)

    # Default path (auto-chosen tiling).
    out = jax.block_until_ready(height2normal(height, intensity))
    assert out.shape == (2, 3, 16, 16)
    assert jnp.allclose(out, ref, atol=1e-5, rtol=1e-5)

    # Force the multi-row-tile path (exercises the cross-tile halo exchange).
    out_tiled = jax.block_until_ready(height2normal(height, intensity, row_tile=8))
    assert jnp.allclose(out_tiled, ref, atol=1e-5, rtol=1e-5)

    print("KERNEL_OK")
</pallas_src>

<mosaic_0001>
module attributes {stable_mosaic.version = 11 : i64} {
  func.func @_h2n_kernel(%arg0: i32, %arg1: i32, %arg2: memref<1x16x16xf32, #tpu.memory_space<vmem>>, %arg3: memref<1x1x2x16xf32, #tpu.memory_space<vmem>>, %arg4: memref<1x1xf32, #tpu.memory_space<smem>>, %arg5: memref<1x3x16x16xf32, #tpu.memory_space<vmem>>) attributes {dimension_semantics = [#tpu.dimension_semantics<parallel>, #tpu.dimension_semantics<parallel>], iteration_bounds = array<i64: 2, 1>, scalar_prefetch = 0 : i64, scratch_operands = 0 : i64, tpu.core_type = #tpu.core_type<tc>, window_params = [{transform_indices = @transform_0, window_bounds = array<i64: 1, 16, 16>}, {transform_indices = @transform_1, window_bounds = array<i64: 1, 1, 2, 16>}, {transform_indices = @transform_2, window_bounds = array<i64: 1, 1>}, {transform_indices = @transform_3, window_bounds = array<i64: 1, 3, 16, 16>}]} {
    %c0 = arith.constant 0 : index
    %c0_0 = arith.constant 0 : index
    %c0_1 = arith.constant 0 : index
    %0 = vector.load %arg2[%c0, %c0_0, %c0_1] : memref<1x16x16xf32, #tpu.memory_space<vmem>>, vector<1x16x16xf32>
    %c0_2 = arith.constant 0 : index
    %c0_3 = arith.constant 0 : index
    %c0_4 = arith.constant 0 : index
    %c0_5 = arith.constant 0 : index
    %1 = vector.load %arg3[%c0_2, %c0_3, %c0_4, %c0_5] : memref<1x1x2x16xf32, #tpu.memory_space<vmem>>, vector<1x1x2x16xf32>
    %2 = vector.shape_cast %1 : vector<1x1x2x16xf32> to vector<1x2x16xf32>
    %3 = vector.extract_strided_slice %2 {offsets = [0, 0, 0], sizes = [1, 1, 16], strides = [1, 1, 1]} : vector<1x2x16xf32> to vector<1x1x16xf32>
    %4 = vector.extract_strided_slice %2 {offsets = [0, 1, 0], sizes = [1, 1, 16], strides = [1, 1, 1]} : vector<1x2x16xf32> to vector<1x1x16xf32>
    %c0_6 = arith.constant 0 : index
    %c0_7 = arith.constant 0 : index
    %5 = memref.load %arg4[%c0_6, %c0_7] : memref<1x1xf32, #tpu.memory_space<smem>>
    %6 = tpu.iota {dimensions = array<i32: 2>} : vector<1x1x16xi32>
    %c0_i32 = arith.constant 0 : i32
    %7 = vector.broadcast %c0_i32 : i32 to vector<1x1x16xi32>
    %8 = arith.cmpi eq, %6, %7 : vector<1x1x16xi32>
    %c15_i32 = arith.constant 15 : i32
    %9 = vector.broadcast %c15_i32 : i32 to vector<1x1x16xi32>
    %10 = arith.cmpi eq, %6, %9 : vector<1x1x16xi32>
    %11 = tpu.iota {dimensions = array<i32: 1>} : vector<1x16x1xi32>
    %c0_i32_8 = arith.constant 0 : i32
    %12 = vector.broadcast %c0_i32_8 : i32 to vector<1x16x1xi32>
    %13 = arith.cmpi eq, %11, %12 : vector<1x16x1xi32>
    %c15_i32_9 = arith.constant 15 : i32
    %14 = vector.broadcast %c15_i32_9 : i32 to vector<1x16x1xi32>
    %15 = arith.cmpi eq, %11, %14 : vector<1x16x1xi32>
    %c1_i32 = arith.constant 1 : i32
    %16 = tpu.dynamic_rotate %0 by %c1_i32 dim 2 : vector<1x16x16xf32>, i32 -> vector<1x16x16xf32>
    %17 = vector.shape_cast %8 : vector<1x1x16xi1> to vector<1x1x16xi1>
    %18 = vector.broadcast %17 : vector<1x1x16xi1> to vector<1x16x16xi1>
    %19 = arith.select %18, %0, %16 : vector<1x16x16xi1>, vector<1x16x16xf32>
    %c15_i32_10 = arith.constant 15 : i32
    %20 = tpu.dynamic_rotate %0 by %c15_i32_10 dim 2 : vector<1x16x16xf32>, i32 -> vector<1x16x16xf32>
    %21 = vector.shape_cast %10 : vector<1x1x16xi1> to vector<1x1x16xi1>
    %22 = vector.broadcast %21 : vector<1x1x16xi1> to vector<1x16x16xi1>
    %23 = arith.select %22, %0, %20 : vector<1x16x16xi1>, vector<1x16x16xf32>
    %24 = arith.subf %23, %19 : vector<1x16x16xf32>
    %cst = arith.constant 2.000000e+00 : f32
    %25 = vector.broadcast %cst : f32 to vector<1x16x16xf32>
    %26 = arith.mulf %25, %0 : vector<1x16x16xf32>
    %27 = arith.addf %19, %26 : vector<1x16x16xf32>
    %28 = arith.addf %27, %23 : vector<1x16x16xf32>
    %c1_i32_11 = arith.constant 1 : i32
    %29 = tpu.dynamic_rotate %3 by %c1_i32_11 dim 2 : vector<1x1x16xf32>, i32 -> vector<1x1x16xf32>
    %30 = arith.select %8, %3, %29 : vector<1x1x16xi1>, vector<1x1x16xf32>
    %c15_i32_12 = arith.constant 15 : i32
    %31 = tpu.dynamic_rotate %3 by %c15_i32_12 dim 2 : vector<1x1x16xf32>, i32 -> vector<1x1x16xf32>
    %32 = arith.select %10, %3, %31 : vector<1x1x16xi1>, vector<1x1x16xf32>
    %33 = arith.subf %32, %30 : vector<1x1x16xf32>
    %cst_13 = arith.constant 2.000000e+00 : f32
    %34 = vector.broadcast %cst_13 : f32 to vector<1x1x16xf32>
    %35 = arith.mulf %34, %3 : vector<1x1x16xf32>
    %36 = arith.addf %30, %35 : vector<1x1x16xf32>
    %37 = arith.addf %36, %32 : vector<1x1x16xf32>
    %c1_i32_14 = arith.constant 1 : i32
    %38 = tpu.dynamic_rotate %4 by %c1_i32_14 dim 2 : vector<1x1x16xf32>, i32 -> vector<1x1x16xf32>
    %39 = arith.select %8, %4, %38 : vector<1x1x16xi1>, vector<1x1x16xf32>
    %c15_i32_15 = arith.constant 15 : i32
    %40 = tpu.dynamic_rotate %4 by %c15_i32_15 dim 2 : vector<1x1x16xf32>, i32 -> vector<1x1x16xf32>
    %41 = arith.select %10, %4, %40 : vector<1x1x16xi1>, vector<1x1x16xf32>
    %42 = arith.subf %41, %39 : vector<1x1x16xf32>
    %cst_16 = arith.constant 2.000000e+00 : f32
    %43 = vector.broadcast %cst_16 : f32 to vector<1x1x16xf32>
    %44 = arith.mulf %43, %4 : vector<1x1x16xf32>
    %45 = arith.addf %39, %44 : vector<1x1x16xf32>
    %46 = arith.addf %45, %41 : vector<1x1x16xf32>
    %c1_i32_17 = arith.constant 1 : i32
    %47 = tpu.dynamic_rotate %24 by %c1_i32_17 dim 1 : vector<1x16x16xf32>, i32 -> vector<1x16x16xf32>
    %48 = vector.shape_cast %13 : vector<1x16x1xi1> to vector<1x16x1xi1>
    %49 = vector.broadcast %48 : vector<1x16x1xi1> to vector<1x16x16xi1>
    %50 = vector.shape_cast %33 : vector<1x1x16xf32> to vector<1x1x16xf32>
    %51 = vector.broadcast %50 : vector<1x1x16xf32> to vector<1x16x16xf32>
    %52 = arith.select %49, %51, %47 : vector<1x16x16xi1>, vector<1x16x16xf32>
    %cst_18 = arith.constant 2.000000e+00 : f32
    %53 = vector.broadcast %cst_18 : f32 to vector<1x16x16xf32>
    %54 = arith.mulf %53, %24 : vector<1x16x16xf32>
    %55 = arith.addf %52, %54 : vector<1x16x16xf32>
    %c15_i32_19 = arith.constant 15 : i32
    %56 = tpu.dynamic_rotate %24 by %c15_i32_19 dim 1 : vector<1x16x16xf32>, i32 -> vector<1x16x16xf32>
    %57 = vector.shape_cast %15 : vector<1x16x1xi1> to vector<1x16x1xi1>
    %58 = vector.broadcast %57 : vector<1x16x1xi1> to vector<1x16x16xi1>
    %59 = vector.shape_cast %42 : vector<1x1x16xf32> to vector<1x1x16xf32>
    %60 = vector.broadcast %59 : vector<1x1x16xf32> to vector<1x16x16xf32>
    %61 = arith.select %58, %60, %56 : vector<1x16x16xi1>, vector<1x16x16xf32>
    %62 = arith.addf %55, %61 : vector<1x16x16xf32>
    %c15_i32_20 = arith.constant 15 : i32
    %63 = tpu.dynamic_rotate %28 by %c15_i32_20 dim 1 : vector<1x16x16xf32>, i32 -> vector<1x16x16xf32>
    %64 = vector.shape_cast %15 : vector<1x16x1xi1> to vector<1x16x1xi1>
    %65 = vector.broadcast %64 : vector<1x16x1xi1> to vector<1x16x16xi1>
    %66 = vector.shape_cast %46 : vector<1x1x16xf32> to vector<1x1x16xf32>
    %67 = vector.broadcast %66 : vector<1x1x16xf32> to vector<1x16x16xf32>
    %68 = arith.select %65, %67, %63 : vector<1x16x16xi1>, vector<1x16x16xf32>
    %c1_i32_21 = arith.constant 1 : i32
    %69 = tpu.dynamic_rotate %28 by %c1_i32_21 dim 1 : vector<1x16x16xf32>, i32 -> vector<1x16x16xf32>
    %70 = vector.shape_cast %13 : vector<1x16x1xi1> to vector<1x16x1xi1>
    %71 = vector.broadcast %70 : vector<1x16x1xi1> to vector<1x16x16xi1>
    %72 = vector.shape_cast %37 : vector<1x1x16xf32> to vector<1x1x16xf32>
    %73 = vector.broadcast %72 : vector<1x1x16xf32> to vector<1x16x16xf32>
    %74 = arith.select %71, %73, %69 : vector<1x16x16xi1>, vector<1x16x16xf32>
    %75 = arith.subf %68, %74 : vector<1x16x16xf32>
    %76 = vector.broadcast %5 : f32 to vector<1x16x16xf32>
    %77 = arith.mulf %76, %62 : vector<1x16x16xf32>
    %78 = vector.broadcast %5 : f32 to vector<1x16x16xf32>
    %79 = arith.mulf %78, %75 : vector<1x16x16xf32>
    %80 = arith.mulf %77, %77 : vector<1x16x16xf32>
    %81 = arith.mulf %79, %79 : vector<1x16x16xf32>
    %82 = arith.addf %80, %81 : vector<1x16x16xf32>
    %cst_22 = arith.constant 1.000000e+00 : f32
    %83 = vector.broadcast %cst_22 : f32 to vector<1x16x16xf32>
    %84 = arith.addf %82, %83 : vector<1x16x16xf32>
    %85 = math.rsqrt %84 : vector<1x16x16xf32>
    %cst_23 = arith.constant 0.000000e+00 : f32
    %86 = vector.broadcast %cst_23 : f32 to vector<1x16x16xf32>
    %87 = arith.subf %86, %77 : vector<1x16x16xf32>
    %88 = arith.mulf %87, %85 : vector<1x16x16xf32>
    %c0_24 = arith.constant 0 : index
    %c0_25 = arith.constant 0 : index
    %c0_26 = arith.constant 0 : index
    %c0_27 = arith.constant 0 : index
    %89 = vector.load %arg5[%c0_24, %c0_25, %c0_26, %c0_27] : memref<1x3x16x16xf32, #tpu.memory_space<vmem>>, vector<1x1x16x16xf32>
    %90 = vector.shape_cast %89 : vector<1x1x16x16xf32> to vector<1x16x16xf32>
    %91 = vector.shape_cast %88 : vector<1x16x16xf32> to vector<1x1x16x16xf32>
    tpu.vector_store %arg5[%c0_24, %c0_25, %c0_26, %c0_27], %91 {strides = array<i32>} : memref<1x3x16x16xf32, #tpu.memory_space<vmem>>, vector<1x1x16x16xf32>,
    %92 = arith.mulf %79, %85 : vector<1x16x16xf32>
    %c0_28 = arith.constant 0 : index
    %c1 = arith.constant 1 : index
    %c0_29 = arith.constant 0 : index
    %c0_30 = arith.constant 0 : index
    %93 = vector.load %arg5[%c0_28, %c1, %c0_29, %c0_30] : memref<1x3x16x16xf32, #tpu.memory_space<vmem>>, vector<1x1x16x16xf32>
    %94 = vector.shape_cast %93 : vector<1x1x16x16xf32> to vector<1x16x16xf32>
    %95 = vector.shape_cast %92 : vector<1x16x16xf32> to vector<1x1x16x16xf32>
    tpu.vector_store %arg5[%c0_28, %c1, %c0_29, %c0_30], %95 {strides = array<i32>} : memref<1x3x16x16xf32, #tpu.memory_space<vmem>>, vector<1x1x16x16xf32>,
    %c0_31 = arith.constant 0 : index
    %c2 = arith.constant 2 : index
    %c0_32 = arith.constant 0 : index
    %c0_33 = arith.constant 0 : index
    %96 = vector.load %arg5[%c0_31, %c2, %c0_32, %c0_33] : memref<1x3x16x16xf32, #tpu.memory_space<vmem>>, vector<1x1x16x16xf32>
    %97 = vector.shape_cast %96 : vector<1x1x16x16xf32> to vector<1x16x16xf32>
    %98 = vector.shape_cast %85 : vector<1x16x16xf32> to vector<1x1x16x16xf32>
    tpu.vector_store %arg5[%c0_31, %c2, %c0_32, %c0_33], %98 {strides = array<i32>} : memref<1x3x16x16xf32, #tpu.memory_space<vmem>>, vector<1x1x16x16xf32>,
    return
  }
  func.func @transform_0(%arg0: i32, %arg1: i32) -> (i32, i32, i32) {
    %c0_i32 = arith.constant 0 : i32
    %c0_i32_0 = arith.constant 0 : i32
    return %arg0, %arg1, %c0_i32 : i32, i32, i32
  }
  func.func @transform_1(%arg0: i32, %arg1: i32) -> (i32, i32, i32, i32) {
    %c0_i32 = arith.constant 0 : i32
    %c0_i32_0 = arith.constant 0 : i32
    %c0_i32_1 = arith.constant 0 : i32
    return %arg0, %arg1, %c0_i32, %c0_i32_0 : i32, i32, i32, i32
  }
  func.func @transform_2(%arg0: i32, %arg1: i32) -> (i32, i32) {
    %c0_i32 = arith.constant 0 : i32
    %c0_i32_0 = arith.constant 0 : i32
    %c0_i32_1 = arith.constant 0 : i32
    return %c0_i32, %c0_i32_0 : i32, i32
  }
  func.func @transform_3(%arg0: i32, %arg1: i32) -> (i32, i32, i32, i32) {
    %c0_i32 = arith.constant 0 : i32
    %c0_i32_0 = arith.constant 0 : i32
    %c0_i32_1 = arith.constant 0 : i32
    return %arg0, %c0_i32, %arg1, %c0_i32_0 : i32, i32, i32, i32
  }
}

</mosaic_0001>

<bundles_post_ra>
// kernel: tpu_custom_call.1
= control target key start
LH: loop header
LB: loop body
LE: loop exit
PB: predicated region body
PF: predicated region fallthrough
CT: control target
= control target key end

     0   :  { %s1036_s0 = inlined_call_operand.hbm [shape: f32[2,16,16], index: 0, kind: input, shape index: {}]   ;;  %s1037_s1 = inlined_call_operand.hbm [shape: f32[2,1,2,16], index: 1, kind: input, shape index: {}]   ;;  %s1038_s2 = inlined_call_operand.<no memory space> [shape: f32[1,1], index: 2, kind: input, shape index: {}]   ;;  %s1039_s3 = inlined_call_operand.hbm [shape: f32[2,3,16,16], index: 3, kind: output, shape index: {}]  }
   0x1   :  { %8 = sst [smem:[#allocation2]] %s1038_s2 }
   0x2   :  { %9 = vsyncpa [#allocation4], 0 }
   0x3   :  { %11 = vsyncpa [#allocation4 + $0x1], 0 }
   0x4   :  { %12 = vsyncpa [#allocation7], 0 }
   0x5   :  { %14 = vsyncpa [#allocation7 + $0x1], 0 }
   0x6   :  { %15 = vsyncpa [#allocation5], 0 }
   0x7   :  { %17 = vsyncpa [#allocation5 + $0x1], 0  ;;  %s854_s14 = smov 0   ;;  %s856_s15 = smov 0  }
   0x8   :  { %s858_s16 = smov 0   ;;  %s860_s17 = smov 0  }
   0x9   :  { %s862_s18 = smov 0   ;;  %s864_s19 = smov 0  }
   0xa LB: > { %s576_s2 = sadd.s32 4294967295, %s822_s19   ;;  %s577_s20 = sadd.s32 4294967294, %s822_s19   ;;  %s822_s19 = sphi %s864_s19, %s23_s19   ;;  %s818_s18 = sphi %s862_s18, %s1049_s18   ;;  %s814_s17 = sphi %s860_s17, %s1048_s17   ;;  %s810_s16 = sphi %s858_s16, %s1047_s16   ;;  %s806_s15 = sphi %s856_s15, %s1046_s15   ;;  %s802_s14 = sphi %s854_s14, %s1045_s14  }
   0xb   : > { %s35_s21 = sadd.s32 1, %s818_s18  ;;  %s44_s22 = sadd.s32 1, %s810_s16 }
   0xc   : > { %p37_p0 = scmp.ge.s32.totalorder %s35_s21, 2  ;;  %p51_p1 = scmp.ne.s32.totalorder %s810_s16, %s806_s15 }
   0xd   : > { %p52_p2 = scmp.eq.s32.totalorder %s822_s19, 0  ;;  %p57_p3 = scmp.ne.s32.totalorder %s806_s15, %s802_s14 }
   0xe   : > { %s1051_s21 = smov (%p37_p0, %s35_s21), 0  ;;  %p58_p5 = scmp.eq.s32.totalorder %s576_s2, 0 }
   0xf   : > { %p895_p4 = por %p52_p2, %p51_p1  ;;  %s39_s24 = ssub.s32 %s818_s18, %s1051_s21 }
  0x10   : > { %p132_p6 = scmp.eq.s32.totalorder %s576_s2, 1  ;;  %p42_p7 = scmp.eq.s32.totalorder %s39_s24, 0 }
  0x11   : > { %p901_p8 = por %p58_p5, %p57_p3  ;;  %p138_p10 = scmp.eq.s32.totalorder %s577_s20, 1 }
  0x12   : > { %p905_p9 = por %p132_p6, %p51_p1  ;;  %p579_p12 = scmp.ge.s32.totalorder %s822_s19, 2 }
  0x13   : > { %s910_s27 = scalar_select %p42_p7, %s810_s16, %s44_s22  }
  0x14   : > { %p912_p11 = por %p138_p10, %p57_p3  ;;  %p615_p13 = scmp.lt.s32.totalorder %s822_s19, 2 }
  0x15   : > { %s161_s29 = sand.u32 1, %s810_s16   ;;  %s595_s4 = sshll.u32 %s818_s18, 4 }
  0x16   : > { %s580_s30 = sshll.u32 %s161_s29, 4  ;;  %s172_s7 = scalar_lea.hbm %s1036_s0, %s595_s4 }
  0x17   : > { %s165_s8 = scalar_lea.vmem [#allocation3], %s580_s30  ;;  %s173_s10 = sshll.u32 %s172_s7, 4  ;;  %s174_s10 = int_to_ptr.hbm [resolvable:$true] %s173_s10 }
  0x18   : > { %s175_s9 = sshll.u32 %s165_s8, 4  ;;  %p925_p0 = pnand %p615_p13, %p895_p4  ;;  %s176_s9 = int_to_ptr.vmem [resolvable:$true] %s175_s9 }
  0x19   : > { %p585_p1 = scmp.ge.s32.totalorder %s822_s19, 1  ;;  %s162_s12 = scalar_lea.sflag [#allocation4], %s161_s29 }
  0x1a   : > { %s824_s13 = smov 128   ;;  %s825_s2 = smov 8  }
  0x1b   : > { %607 = dma.hbm_to_vmem [thread:$0]  (!%p925_p0), %s174_s10, 256, %s176_s9, %s162_s12, %s824_s13, %s824_s13, %s825_s2  }
  0x1c   : > { %p203_p2 = scmp.lt.s32.totalorder %s822_s19, 3  ;;  %s583_s20 = sshll.u32 %s161_s29, 1 }
  0x1d   : > { %s584_s22 = sshll.u32 %s818_s18, 1  ;;  %s189_s4 = scalar_lea.vmem [#allocation6], %s583_s20 }
  0x1e   : > { %p204_p3 = pnand %p585_p1, %p203_p2  ;;  %s194_s23 = scalar_lea.hbm %s1037_s1, %s584_s22 }
  0x1f   : > { %s198_s5 = sshll.u32 %s189_s4, 4  ;;  %s196_s6 = sshll.u32 %s194_s23, 4  ;;  %s199_s5 = int_to_ptr.vmem [resolvable:$true] %s198_s5  ;;  %s197_s6 = int_to_ptr.hbm [resolvable:$true] %s196_s6 }
  0x20   : > { %s186_s7 = scalar_lea.sflag [#allocation7], %s161_s29  ;;  %207 = sbr.rel (%p204_p3) target bundleno = 447 (0x1bf), region = 32 }
  0x21   : > { %610 = dma.hbm_to_vmem [thread:$0]  (!%p925_p0), %s197_s6, 32, %s199_s5, %s186_s7  }
  0x22   : > { %s940_s8 = sand.u32 (!%p204_p3), 1, %s806_s15  }
  0x23   : > { %s586_s9 = sshll.u32 (!%p204_p3), %s940_s8, 4  ;;  %s210_s10 = scalar_lea.sflag (!%p204_p3), [#allocation4], %s940_s8 }
  0x24   : > { %s213_s12 = scalar_lea.vmem (!%p204_p3), [#allocation3], %s586_s9 }
  0x25   : > { %789 = dma.done.wait (%p901_p8), %s210_s10, 256  }
  0x26   : > { %791 = vsyncadd (%p901_p8), %s210_s10, 4294967040  ;;  %s587_s29 = sshll.u32 %s940_s8, 1  ;;  %s220_s11 = scalar_lea.sflag [#allocation7], %s940_s8 }
  0x27   : > { %s223_s13 = scalar_lea.vmem [#allocation6], %s587_s29 }
  0x28   : > { %793 = dma.done.wait (%p901_p8), %s220_s11, 32  }
  0x29   : > { %795 = vsyncadd (%p901_p8), %s220_s11, 4294967264  ;;  %v255_v0 = vld [vmem:[%s213_s12 + $0x8] sm:$0xff]  ;;  %v954_v1 = vld [vmem:[%s223_s13] sm:$0x3]  ;;  %s826_s2 = smov 16   ;;  %vm269_vm0 = vcmask 1047680   ;;  %v258_v22 = vlaneseq }
  0x2a   : > { %273 = vrot.lane.b32.xlu1 %v255_v0, %s826_s2  ;;  %v332_v2 = vrot.slane %v954_v1, 1  ;;  %v254_v3 = vld [vmem:[%s213_s12] sm:$0xff]  ;;  %s827_s25 = smov 127   ;;  %s828_s20 = smov 113   ;;  %v307_v26 = vmul.f32 2.0, %v255_v0  ;;  %v328_v40 = vmul.f32 2.0, %v954_v1 }
  0x2b   : > { %v259_v23 = vand.u32 127, %v258_v22  ;;  %v306_v29 = vmul.f32 2.0, %v254_v3  ;;  %s257_s22 = sld [smem:[#allocation2]]  ;;  %v263_v35 = vshrl.u32 %v258_v22, 7  ;;  %s596_s24 = smul.u32 48, %s940_s8  ;;  %vm436_vm8 = vcmask 130048  }
  0x2c   : > { %334 = vrot.lane.b32.xlu0 %v332_v2, %s826_s2  ;;  %s597_s30 = smul.u32 48, %s814_s17  ;;  %s448_s9 = scalar_lea.sflag [#allocation5], %s940_s8 }
  0x2d   : > { %vm260_vm1 = vcmp.eq.s32.totalorder %v259_v23, 0  ;;  %vm261_vm2 = vcmp.eq.s32.totalorder %v259_v23, 15  ;;  %vm355_vm3 = vcmp.lt.s32.totalorder %v263_v35, 1  ;;  %vm371_vm4 = vcmp.lt.s32.totalorder %v263_v35, 7  ;;  %s251_s23 = scalar_lea.vmem [#allocation8], %s596_s24  ;;  %s756_s13 = scalar_lea.hbm %s1039_s3, 96 }
  0x2e   : > { %vm265_vm5 = vcmp.eq.s32.totalorder %v263_v35, 0  ;;  %s461_s6 = scalar_lea.hbm %s1039_s3, %s597_s30  ;;  %s462_s17 = sshll.u32 %s251_s23, 4  ;;  %s463_s17 = int_to_ptr.vmem [resolvable:$true] %s462_s17 }
  0x2f   : > { %s464_s7 = sshll.u32 %s461_s6, 4  ;;  %s465_s7 = int_to_ptr.hbm [resolvable:$true] %s464_s7 }
  0x30   : > { %s750_s10 = sshra.s32 %s465_s7, 4  ;;  %s751_s10 = int_to_ptr.hbm [resolvable:$true] %s750_s10 }
  0x31   : > { %v399_v59 = vstv %s257_s22  ;;  %s752_s12 = scalar_lea.hbm %s751_s10, 48  ;;  %p757_p7 = scmp.lt.s32.totalorder %s751_s10, %s1039_s3 }
  0x32   : > { %312 = vrot.lane.b32.xlu1 %v954_v1, %s826_s2  ;;  %p753_p4 = scmp.ne.s32.totalorder %s751_s10, %s752_s12  ;;  %p758_p8 = scmp.lt.s32.totalorder %s756_s13, %s752_s12 }
  0x34   : > { %270 = vrot.lane.b32.xlu0 %v254_v3, %s826_s2  ;;  %p754_p5 = pnand %p753_p4, %p905_p9  ;;  %p759_p10 = por %p758_p8, %p757_p7 }
  0x36   : > { %p755_p6 = pneg %p754_p5 }
  0x38   : > { %p760_p13 = pnand %p759_p10, %p755_p6 }
  0x9c   : > { %v274_v4 = vpop.permute.xlu1 %273 }
  0x9d   : > { %v275_v5 = vsel %vm269_vm0, %v274_v4, %v255_v0  ;;  %v264_v4 = vadd.s32 8, %v263_v35 }
  0x9e   : > { %v335_v6 = vpop.permute.xlu0 %334  ;;  %278 = vrot.lane.b32.xlu0 %v275_v5, %s826_s2 }
  0x9f   : > { %v336_v7 = vsel %vm269_vm0, %v335_v6, %v332_v2  ;;  %vm268_vm6 = vcmp.eq.s32.totalorder %v264_v4, 15 }
  0xa0   : > { %337 = vrot.lane.b32.xlu2 %v336_v7, %s826_s2 }
  0xa4   : > { %v313_v8 = vpop.permute.xlu1 %312 }
  0xa5   : > { %v314_v9 = vsel %vm269_vm0, %v313_v8, %v954_v1 }
  0xa6   : > { %315 = vrot.lane.b32.xlu1 %v314_v9, %s826_s2  ;;  %v271_v10 = vpop.permute.xlu0 %270 }
  0xa7   : > { %v272_v11 = vsel %vm269_vm0, %v271_v10, %v254_v3 }
  0xa8   : > { %276 = vrot.lane.b32.xlu2 %v272_v11, %s826_s2 }
  0xfa   : > { %v338_v12 = vpop.permute.xlu2 %337 }
  0xfb   : > { %v339_v17 = vsel %vm269_vm0, %v338_v12, %v332_v2 }
  0xfc   : > { %v341_v18 = vrot.slane %v339_v17, 7 }
 0x102   : > { %v277_v13 = vpop.permute.xlu2 %276 }
 0x103   : > { %v280_v14 = vsel %vm269_vm0, %v277_v13, %v254_v3 }
 0x104   : > { %296 = vrot.lane.b32.xlu1 %v280_v14, %s827_s25  ;;  %286 = vrot.lane.b32.xlu2 %v280_v14, %s828_s20 }
 0x110   : > { %v279_v15 = vpop.permute.xlu0 %278 }
 0x111   : > { %v281_v16 = vsel %vm269_vm0, %v279_v15, %v255_v0 }
 0x112   : > { %298 = vrot.lane.b32.xlu2 %v281_v16, %s827_s25  ;;  %288 = vrot.lane.b32.xlu0 %v281_v16, %s828_s20 }
 0x118   : > { %v316_v19 = vpop.permute.xlu1 %315 }
 0x119   : > { %v317_v20 = vsel %vm269_vm0, %v316_v19, %v954_v1 }
 0x11a   : > { %323 = vrot.lane.b32.xlu1 %v317_v20, %s827_s25  ;;  %342 = vrot.lane.b32.xlu2 %v341_v18, %s828_s20 }
 0x11b   : > { %319 = vrot.lane.b32.xlu0 %v317_v20, %s828_s20 }
 0x123   : > { %346 = vrot.lane.b32.xlu0 %v341_v18, %s827_s25 }
 0x15e   : > { %v287_v21 = vpop.permute.xlu2 %286 }
 0x15f   : > { %v292_v31 = vsel %vm260_vm1, %v254_v3, %v287_v21 }
 0x160   : > { %v308_v36 = vadd.f32 %v306_v29, %v292_v31 }
 0x16c   : > { %v299_v24 = vpop.permute.xlu2 %298 }
 0x16d   : > { %v303_v32 = vsel %vm261_vm2, %v255_v0, %v299_v24 }
 0x174   : > { %v343_v41 = vpop.permute.xlu2 %342 }
 0x175   : > { %v345_v49 = vsel %vm260_vm1, %v954_v1, %v343_v41 }
 0x176   : > { %v297_v25 = vpop.permute.xlu1 %296 }
 0x177   : > { %v302_v33 = vsel %vm261_vm2, %v254_v3, %v297_v25 }
 0x178   : > { %v304_v37 = vsub.f32 %v302_v33, %v292_v31  ;;  %v310_v44 = vadd.f32 %v308_v36, %v302_v33 }
 0x17a   : > { %v353_v50 = vrot.slane %v304_v37, 7  ;;  %v365_v56 = vmul.f32 2.0, %v304_v37  ;;  %v390_v57 = vrot.slane %v310_v44, 7  ;;  %v369_v60 = vrot.slane %v304_v37, 1 }
 0x17b   : > { %v383_v61 = vrot.slane %v310_v44, 1 }
 0x184   : > { %v289_v27 = vpop.permute.xlu0 %288 }
 0x185   : > { %v293_v28 = vsel %vm260_vm1, %v255_v0, %v289_v27  ;;  %v351_v0 = vadd.f32 %v345_v49, %v328_v40 }
 0x186   : > { %v309_v30 = vadd.f32 %v307_v26, %v293_v28  ;;  %v305_v34 = vsub.f32 %v303_v32, %v293_v28 }
 0x188   : > { %v311_v38 = vadd.f32 %v309_v30, %v303_v32  ;;  %v354_v45 = vrot.slane %v305_v34, 7  ;;  %v370_v52 = vrot.slane %v305_v34, 1  ;;  %v366_v5 = vmul.f32 2.0, %v305_v34 }
 0x18a   : > { %v391_v51 = vrot.slane %v311_v38, 7  ;;  %v384_v53 = vrot.slane %v311_v38, 1  ;;  %v357_v58 = vsel %vm355_vm3, %v354_v45, %v353_v50  ;;  %v372_v7 = vsel %vm371_vm4, %v369_v60, %v370_v52 }
 0x18b   : > { %v356_v10 = vsel %vm355_vm3, %v353_v50, %v354_v45  ;;  %v373_v24 = vsel %vm371_vm4, %v370_v52, %v369_v60 }
 0x18c   : > { %v324_v39 = vpop.permute.xlu1 %323  ;;  %v393_v2 = vsel %vm355_vm3, %v391_v51, %v390_v57  ;;  %v385_v6 = vsel %vm371_vm4, %v383_v61, %v384_v53  ;;  %v368_v18 = vadd.f32 %v366_v5, %v356_v10  ;;  %v386_v25 = vsel %vm371_vm4, %v384_v53, %v383_v61 }
 0x18d   : > { %v326_v42 = vsel %vm261_vm2, %v954_v1, %v324_v39  ;;  %v320_v43 = vpop.permute.xlu0 %319  ;;  %v392_v28 = vsel %vm355_vm3, %v390_v57, %v391_v51 }
 0x18e   : > { %v322_v46 = vsel %vm260_vm1, %v954_v1, %v320_v43 }
 0x18f   : > { %v327_v47 = vsub.f32 %v326_v42, %v322_v46  ;;  %v329_v48 = vadd.f32 %v328_v40, %v322_v46 }
 0x191   : > { %v330_v54 = vadd.f32 %v329_v48, %v326_v42  ;;  %v362_v55 = vperm.slane %v327_v47, 0 }
 0x193   : > { %v363_v62 = vsel %vm265_vm5, %v362_v55, %v357_v58  ;;  %v394_v63 = vperm.slane %v330_v54, 0 }
 0x194   : > { %v367_v3 = vadd.f32 %v365_v56, %v363_v62 }
 0x195   : > { %v395_v8 = vsel %vm265_vm5, %v394_v63, %v393_v2  ;;  %v347_v9 = vpop.permute.xlu0 %346 }
 0x196   : > { %v381_v11 = vadd.f32 %v372_v7, %v367_v3  ;;  %v397_v12 = vsub.f32 %v385_v6, %v395_v8  ;;  %v349_v13 = vsel %vm261_vm2, %v954_v1, %v347_v9 }
 0x197   : > { %v350_v14 = vsub.f32 %v349_v13, %v345_v49  ;;  %v352_v15 = vadd.f32 %v351_v0, %v349_v13 }
 0x198   : > { %v400_v16 = vmul.f32 %v399_v59, %v381_v11  ;;  %v402_v17 = vmul.f32 %v399_v59, %v397_v12 }
 0x199   : > { %v378_v19 = vperm.slane %v350_v14, 1  ;;  %v387_v20 = vperm.slane %v352_v15, 1 }
 0x19a   : > { %v404_v21 = vmul.f32 %v400_v16, %v400_v16  ;;  %v406_v22 = vmul.f32 %v402_v17, %v402_v17  ;;  %v432_v46 = vsub.f32 0.0, %v400_v16 }
 0x19b   : > { %v380_v26 = vsel %vm268_vm6, %v378_v19, %v373_v24  ;;  %v389_v27 = vsel %vm268_vm6, %v387_v20, %v386_v25 }
 0x19c   : > { %v408_v1 = vadd.f32 %v406_v22, %v404_v21  ;;  %v382_v23 = vadd.f32 %v380_v26, %v368_v18  ;;  %v398_v29 = vsub.f32 %v389_v27, %v392_v28 }
 0x19e   : > { %v410_v30 = vadd.f32 1.0, %v408_v1  ;;  %v401_v31 = vmul.f32 %v399_v59, %v382_v23  ;;  %v403_v32 = vmul.f32 %v399_v59, %v398_v29 }
 0x1a0   : > { %672 = vrsqrt.f32 %v410_v30  ;;  %v405_v33 = vmul.f32 %v401_v31, %v401_v31  ;;  %v407_v34 = vmul.f32 %v403_v32, %v403_v32  ;;  %vm418_vm9 = vweird.f32 %v410_v30 }
 0x1a1   : > { %v433_v53 = vsub.f32 0.0, %v401_v31 }
 0x1a2   : > { %v409_v36 = vadd.f32 %v407_v34, %v405_v33 }
 0x1a4   : > { %v411_v37 = vadd.f32 1.0, %v409_v36 }
 0x1a6   : > { %v673_v38 = vpop.eup %672  ;;  %674 = vrsqrt.f32 %v411_v37  ;;  %vm428_vm12 = vweird.f32 %v411_v37 }
 0x1a7   : > { %v413_v39 = vmul.f32 %v673_v38, %v410_v30  ;;  %vm419_vm7 = vweird.f32 %v673_v38 }
 0x1a8   : > { %vm420_vm10 = vmor %vm418_vm9, %vm419_vm7 }
 0x1a9   : > { %v414_v40 = vmul.f32 %v673_v38, %v413_v39 }
 0x1ab   : > { %v415_v35 = vmul.f32 0.5, %v414_v40 }
 0x1ac   : > { %v675_v41 = vpop.eup %674 }
 0x1ad   : > { %v416_v42 = vsub.f32 1.5, %v415_v35  ;;  %v423_v43 = vmul.f32 %v675_v41, %v411_v37  ;;  %vm429_vm11 = vweird.f32 %v675_v41 }
 0x1ae   : > { %vm430_vm13 = vmor %vm428_vm12, %vm429_vm11 }
 0x1af   : > { %v417_v44 = vmul.f32 %v673_v38, %v416_v42  ;;  %v424_v45 = vmul.f32 %v675_v41, %v423_v43 }
 0x1b1   : > { %v421_v47 = vsel %vm420_vm10, %v673_v38, %v417_v44  ;;  %v425_v48 = vmul.f32 0.5, %v424_v45 }
 0x1b2   : > { %v434_v49 = vmul.f32 %v432_v46, %v421_v47  ;;  %v439_v50 = vmul.f32 %v421_v47, %v402_v17  ;;  %590 = vst.msk [vmem:[%s251_s23 + $0x20] sm:$0xff] %vm436_vm8, %v421_v47 }
 0x1b3   : > { %v426_v51 = vsub.f32 1.5, %v425_v48 }
 0x1b4   : > { %437 = vst.msk [vmem:[%s251_s23] sm:$0xff] %vm436_vm8, %v434_v49 }
 0x1b5   : > { %588 = vst.msk [vmem:[%s251_s23 + $0x10] sm:$0xff] %vm436_vm8, %v439_v50  ;;  %v427_v52 = vmul.f32 %v675_v41, %v426_v51 }
 0x1b7   : > { %v431_v54 = vsel %vm430_vm13, %v675_v41, %v427_v52 }
 0x1b8   : > { %v435_v55 = vmul.f32 %v433_v53, %v431_v54  ;;  %v440_v56 = vmul.f32 %v431_v54, %v403_v32  ;;  %591 = vst.msk [vmem:[%s251_s23 + $0x28] sm:$0xff] %vm436_vm8, %v431_v54 }
 0x1ba   : > { %438 = vst.msk [vmem:[%s251_s23 + $0x8] sm:$0xff] %vm436_vm8, %v435_v55 }
 0x1bb   : > { %589 = vst.msk [vmem:[%s251_s23 + $0x18] sm:$0xff] %vm436_vm8, %v440_v56 }
 0x1bc   : > { %763 = shalt.err (!%p760_p13)
}
 0x1bd   : > { %s829_s8 = smov 128   ;;  %s830_s20 = smov 8  }
 0x1be   : > { %602 = dma.vmem_to_hbm [thread:$0]  (%p905_p9), %s463_s17, 768, %s465_s7, %s448_s9, %s829_s8, %s829_s8, %s830_s20  }
 0x1bf PF: > { %s479_s22 = sand.u32 1, %s802_s14   ;;  %p612_p0 = pnand %p579_p12, %p912_p11 }
 0x1c0   : > { %s480_s24 = scalar_lea.sflag [#allocation5], %s479_s22 }
 0x1c1   : > { %p613_p1 = pneg %p612_p0 }
 0x1c3   : > { %797 = dma.done.wait (%p613_p1), %s480_s24, 768  }
 0x1c4   : > { %799 = vsyncadd (%p613_p1), %s480_s24, 4294966528  ;;  %s23_s19 = sadd.s32 1, %s822_s19   ;;  %s1045_s14 = smov %s806_s15 }
 0x1c5   : > { %p20_p2 = scmp.ge.s32.totalorder %s23_s19, 4   ;;  %s1046_s15 = smov %s810_s16 }
 0x1c6   : > { %s1047_s16 = smov %s910_s27  ;;  %s1048_s17 = smov %s818_s18 }
 0x1c7   : > { %s1049_s18 = smov %s1051_s21  ;;  %22 = sbr.rel (!%p20_p2) target bundleno = 10 (0xa), region = 92 }
 0x1cc   :  { %486 = vsyncpa [#allocation4], 1 }
 0x1cd   :  { %488 = vsyncpa [#allocation4 + $0x1], 1 }
 0x1ce   :  { %489 = vsyncpa [#allocation7], 1 }
 0x1cf   :  { %491 = vsyncpa [#allocation7 + $0x1], 1 }
 0x1d0   :  { %492 = vsyncpa [#allocation5], 1 }
 0x1d1   :  { %494 = vsyncpa [#allocation5 + $0x1], 1 }

</bundles_post_ra>
